<compile_context>
chip_gen: v5e
topology: v5e:2x2
jax: 0.10.0
libtpu: 0.0.40
codegen_flags: <defaults>
</compile_context>

<pallas_src>
import math

import jax
import jax.numpy as jnp
from jax.experimental import pallas as pl
from jax.experimental.pallas import tpu as pltpu


def mlp_kernel(x_ref, w1_ref, b1_ref, w2_ref, b2_ref, w3_ref, b3_ref, out_ref):
    # x tile: (TILE_B, F) — batch on sublanes, features on lanes. May arrive
    # as bf16 (halved HBM traffic); all math is done in f32.
    x = x_ref[...].astype(jnp.float32)

    # Layer 1: Linear(F, 10) + LeakyReLU(negative_slope=0.01)   (MXU)
    h1 = jnp.dot(x, w1_ref[...], preferred_element_type=jnp.float32) + b1_ref[...]
    h1 = jnp.where(h1 >= 0.0, h1, 0.01 * h1)

    # Layer 2: Linear(10, 10) + Sigmoid (EUP)
    h2 = jnp.dot(h1, w2_ref[...], preferred_element_type=jnp.float32) + b2_ref[...]
    h2 = jax.nn.sigmoid(h2)

    # Layer 3: Linear(10, 1) as a VPU multiply + lane reduction (no MXU),
    # written as a lane-dense (1, TILE_B) block (unmasked full-lane stores).
    # The sublane->lane relayout is a handful of XLU ops per tile and stays
    # hidden under the x DMA (output is <4% of the kernel's HBM traffic).
    h3 = jnp.sum(h2 * w3_ref[...], axis=-1)                 # (TILE_B,)
    out_ref[...] = (h3[None, :] + b3_ref[...]).astype(out_ref.dtype)


def _round_up(v, m):
    return ((v + m - 1) // m) * m


def network_forward(x, params, tile_b=8192, x_dtype=None, x_buffers=3,
                    batch_dim_semantics="parallel"):
    """x: (B, F). Returns (B, 1) f32 logits (raw, matching Network.forward).

    tile_b:   batch rows per grid step (must be a multiple of 128). Large
              tiles amortize the ~0.35 us per-step overhead.
    x_dtype:  optionally stream x as jnp.bfloat16 to halve HBM traffic
              (compute stays f32).
    x_buffers: pipeline depth for the streamed x tiles (3 keeps the DMA queue
              full across step boundaries; falls back to 2 if unsupported).
    batch_dim_semantics: "parallel" by default; pass pltpu.CORE_PARALLEL on
              v7x to split the batch DMA streams across both TensorCores.
    """
    w1, b1, w2, b2, w3, b3 = params
    if x_dtype is not None and x.dtype != x_dtype:
        x = x.astype(x_dtype)
    B, F = x.shape

    # TILE_B must be a multiple of 128 (lane-dense output block) unless it
    # covers the whole batch. Partial trailing tiles are handled by Pallas
    # (padded reads, masked writes); rows are independent so this is safe.
    assert tile_b % 128 == 0, "tile_b must be a multiple of 128"
    TILE_B = B if B <= tile_b else tile_b
    num_steps = pl.cdiv(B, TILE_B)
    grid = (num_steps,)

    # --- streamed x BlockSpec (optionally >2-deep buffered) ---
    x_index = lambda i: (i, 0)
    n_x_bufs = 2
    x_spec = pl.BlockSpec((TILE_B, F), x_index)
    if x_buffers is not None and x_buffers > 2 and num_steps > 2:
        try:
            x_spec = pl.BlockSpec((TILE_B, F), x_index,
                                  pipeline_mode=pl.Buffered(x_buffers))
            n_x_bufs = x_buffers
        except (TypeError, AttributeError):
            x_spec = pl.BlockSpec((TILE_B, F), x_index)   # older API: 2 bufs
            n_x_bufs = 2

    def const(shape):
        return pl.BlockSpec(shape, lambda i: (0, 0))      # resident weights

    # --- VMEM budget (blocks are lane-padded to 128, sublane-padded to 8) ---
    x_item = jnp.dtype(x.dtype).itemsize
    x_vmem = n_x_bufs * _round_up(TILE_B, 8) * _round_up(F, 128) * x_item
    out_vmem = 2 * 8 * _round_up(TILE_B, 128) * 4
    vmem_limit = int(max(16 << 20, min(x_vmem + out_vmem + (4 << 20), 100 << 20)))

    # Advisory cost hint: the kernel is bandwidth-bound on x.
    flops = 2 * B * (F * 10 + 10 * 10 + 10)
    transcendentals = B * 10  # sigmoid
    bytes_accessed = int(x_item * B * F
                         + 4 * (B + F * 10 + 10 + 10 * 10 + 10 + 10 + 1))

    out_flat = pl.pallas_call(
        mlp_kernel,
        out_shape=jax.ShapeDtypeStruct((1, B), jnp.float32),
        grid=grid,
        in_specs=[
            x_spec,                                        # streamed x tiles
            const(w1.shape), const(b1.shape),              # resident weights
            const(w2.shape), const(b2.shape),
            const(w3.shape), const(b3.shape),
        ],
        out_specs=pl.BlockSpec((1, TILE_B), lambda i: (0, i)),  # lane-dense
        compiler_params=pltpu.CompilerParams(
            dimension_semantics=(batch_dim_semantics,),
            vmem_limit_bytes=vmem_limit,
        ),
        cost_estimate=pl.CostEstimate(
            flops=flops,
            transcendentals=transcendentals,
            bytes_accessed=bytes_accessed,
        ),
    )(x, w1, b1, w2, b2, w3, b3)
    return out_flat.reshape(B, 1)


def init_params(key, num_features):
    """Deterministic init mirroring the PyTorch __init__ (kaiming_uniform(a=0.01),
    xavier_uniform, and N(0,1) biases, exactly as the module overrides)."""
    k = jax.random.split(key, 6)

    # layer1: kaiming_uniform_(a=0.01) on weight (10, F) -> stored transposed (F, 10)
    gain1 = math.sqrt(2.0 / (1.0 + 0.01 ** 2))
    bound1 = gain1 * math.sqrt(3.0 / num_features)
    w1 = jax.random.uniform(k[0], (num_features, 10), jnp.float32, -bound1, bound1)
    b1 = jax.random.normal(k[1], (1, 10), jnp.float32)

    # layer2: xavier_uniform_ on weight (10, 10) -> stored transposed (10, 10)
    bound2 = math.sqrt(6.0 / (10 + 10))
    w2 = jax.random.uniform(k[2], (10, 10), jnp.float32, -bound2, bound2)
    b2 = jax.random.normal(k[3], (1, 10), jnp.float32)

    # layer3: xavier_uniform_ on weight (1, 10) -> kept in PyTorch layout (1, 10)
    bound3 = math.sqrt(6.0 / (10 + 1))
    w3 = jax.random.uniform(k[4], (1, 10), jnp.float32, -bound3, bound3)
    b3 = jax.random.normal(k[5], (1, 1), jnp.float32)

    return (w1, b1, w2, b2, w3, b3)


if __name__ == "__main__":
    num_features = 32

    key = jax.random.PRNGKey(0)
    kx1, kx2, kx3, kp = jax.random.split(key, 4)
    params = init_params(kp, num_features)
    w1, b1, w2, b2, w3, b3 = params

    def ref_forward(xx):
        h = xx @ w1 + b1
        h = jnp.where(h >= 0, h, 0.01 * h)
        h = jax.nn.sigmoid(h @ w2 + b2)
        return h @ w3.T + b3

    # Small case: single tile, grid=(1,)
    x = jax.random.normal(kx1, (8, num_features), jnp.float32)
    out = jax.block_until_ready(network_forward(x, params))
    assert out.shape == (8, 1)
    assert jnp.allclose(out, ref_forward(x), atol=1e-5), "mismatch vs reference (B=8)"

    # Multi-tile case with a partial trailing tile: grid=(3,), TILE_B=128
    x2 = jax.random.normal(kx2, (300, num_features), jnp.float32)
    out2 = jax.block_until_ready(network_forward(x2, params, tile_b=128))
    assert out2.shape == (300, 1)
    assert jnp.allclose(out2, ref_forward(x2), atol=1e-5), "mismatch vs reference (B=300)"

    # Default large-tile config (tile_b=8192, Buffered(3), vmem_limit set),
    # with a partial trailing tile: grid=(3,)
    x3 = jax.random.normal(kx3, (20000, num_features), jnp.float32)
    out3 = jax.block_until_ready(network_forward(x3, params))
    assert out3.shape == (20000, 1)
    assert jnp.allclose(out3, ref_forward(x3), atol=1e-4), "mismatch vs reference (B=20000)"

    # Optional bf16-x streaming path (halves x HBM traffic; compute stays f32).
    out3_bf16 = jax.block_until_ready(
        network_forward(x3, params, x_dtype=jnp.bfloat16))
    ref_bf16 = ref_forward(x3.astype(jnp.bfloat16).astype(jnp.float32))
    assert jnp.allclose(out3_bf16, ref_bf16, atol=2e-3), "mismatch vs reference (bf16 x)"

    # TODO(synk): training utilities (do_train / predict / save / load) are host-side
    # PyTorch code, not part of forward(), and are not translated.
    print("KERNEL_OK")
</pallas_src>

<mosaic_0001>
module attributes {stable_mosaic.version = 11 : i64} {
  func.func @mlp_kernel(%arg0: i32, %arg1: memref<8x32xf32, #tpu.memory_space<vmem>>, %arg2: memref<32x10xf32, #tpu.memory_space<vmem>>, %arg3: memref<1x10xf32, #tpu.memory_space<vmem>>, %arg4: memref<10x10xf32, #tpu.memory_space<vmem>>, %arg5: memref<1x10xf32, #tpu.memory_space<vmem>>, %arg6: memref<1x10xf32, #tpu.memory_space<vmem>>, %arg7: memref<1x1xf32, #tpu.memory_space<vmem>>, %arg8: memref<1x8xf32, #tpu.memory_space<vmem>>) attributes {dimension_semantics = [#tpu.dimension_semantics<parallel>], iteration_bounds = array<i64: 1>, scalar_prefetch = 0 : i64, scratch_operands = 0 : i64, tpu.core_type = #tpu.core_type<tc>, window_params = [{transform_indices = @transform_0, window_bounds = array<i64: 8, 32>}, {pipeline_mode = #tpu.pipeline_mode<synchronous>, transform_indices = @transform_1, window_bounds = array<i64: 32, 10>}, {pipeline_mode = #tpu.pipeline_mode<synchronous>, transform_indices = @transform_2, window_bounds = array<i64: 1, 10>}, {pipeline_mode = #tpu.pipeline_mode<synchronous>, transform_indices = @transform_3, window_bounds = array<i64: 10, 10>}, {pipeline_mode = #tpu.pipeline_mode<synchronous>, transform_indices = @transform_4, window_bounds = array<i64: 1, 10>}, {pipeline_mode = #tpu.pipeline_mode<synchronous>, transform_indices = @transform_5, window_bounds = array<i64: 1, 10>}, {pipeline_mode = #tpu.pipeline_mode<synchronous>, transform_indices = @transform_6, window_bounds = array<i64: 1, 1>}, {transform_indices = @transform_7, window_bounds = array<i64: 1, 8>}]} {
    %c0 = arith.constant 0 : index
    %c0_0 = arith.constant 0 : index
    %0 = vector.load %arg1[%c0, %c0_0] : memref<8x32xf32, #tpu.memory_space<vmem>>, vector<8x32xf32>
    %c0_1 = arith.constant 0 : index
    %c0_2 = arith.constant 0 : index
    %1 = vector.load %arg2[%c0_1, %c0_2] : memref<32x10xf32, #tpu.memory_space<vmem>>, vector<32x10xf32>
    %cst = arith.constant dense<0.000000e+00> : vector<8x10xf32>
    %2 = tpu.matmul %0, %1, %cst {dimension_numbers = #tpu.dot_dimension_numbers<[1], [0], [0], [1], [0, 0, 1, 1], [], []>} : vector<8x32xf32>, vector<32x10xf32>, vector<8x10xf32> -> vector<8x10xf32>
    %c0_3 = arith.constant 0 : index
    %c0_4 = arith.constant 0 : index
    %3 = vector.load %arg3[%c0_3, %c0_4] : memref<1x10xf32, #tpu.memory_space<vmem>>, vector<1x10xf32>
    %4 = vector.broadcast %3 : vector<1x10xf32> to vector<8x10xf32>
    %5 = arith.addf %2, %4 : vector<8x10xf32>
    %cst_5 = arith.constant 0.000000e+00 : f32
    %6 = vector.broadcast %cst_5 : f32 to vector<8x10xf32>
    %7 = arith.cmpf oge, %5, %6 : vector<8x10xf32>
    %cst_6 = arith.constant 0.00999999977 : f32
    %8 = vector.broadcast %cst_6 : f32 to vector<8x10xf32>
    %9 = arith.mulf %8, %5 : vector<8x10xf32>
    %10 = arith.select %7, %5, %9 : vector<8x10xi1>, vector<8x10xf32>
    %c0_7 = arith.constant 0 : index
    %c0_8 = arith.constant 0 : index
    %11 = vector.load %arg4[%c0_7, %c0_8] : memref<10x10xf32, #tpu.memory_space<vmem>>, vector<10x10xf32>
    %cst_9 = arith.constant dense<0.000000e+00> : vector<8x10xf32>
    %12 = tpu.matmul %10, %11, %cst_9 {dimension_numbers = #tpu.dot_dimension_numbers<[1], [0], [0], [1], [0, 0, 1, 1], [], []>} : vector<8x10xf32>, vector<10x10xf32>, vector<8x10xf32> -> vector<8x10xf32>
    %c0_10 = arith.constant 0 : index
    %c0_11 = arith.constant 0 : index
    %13 = vector.load %arg5[%c0_10, %c0_11] : memref<1x10xf32, #tpu.memory_space<vmem>>, vector<1x10xf32>
    %14 = vector.broadcast %13 : vector<1x10xf32> to vector<8x10xf32>
    %15 = arith.addf %12, %14 : vector<8x10xf32>
    %16 = arith.negf %15 : vector<8x10xf32>
    %17 = math.exp %16 : vector<8x10xf32>
    %cst_12 = arith.constant 1.000000e+00 : f32
    %18 = vector.broadcast %cst_12 : f32 to vector<8x10xf32>
    %19 = arith.addf %18, %17 : vector<8x10xf32>
    %20 = arith.divf %18, %19 : vector<8x10xf32>
    %c0_13 = arith.constant 0 : index
    %c0_14 = arith.constant 0 : index
    %21 = vector.load %arg6[%c0_13, %c0_14] : memref<1x10xf32, #tpu.memory_space<vmem>>, vector<1x10xf32>
    %22 = vector.broadcast %21 : vector<1x10xf32> to vector<8x10xf32>
    %23 = arith.mulf %20, %22 : vector<8x10xf32>
    %cst_15 = arith.constant dense<0.000000e+00> : vector<8xf32>
    %24 = vector.multi_reduction <add>, %23, %cst_15 [1] : vector<8x10xf32> to vector<8xf32>
    %25 = vector.shape_cast %24 : vector<8xf32> to vector<1x8xf32>
    %c0_16 = arith.constant 0 : index
    %c0_17 = arith.constant 0 : index
    %26 = vector.load %arg7[%c0_16, %c0_17] : memref<1x1xf32, #tpu.memory_space<vmem>>, vector<1x1xf32>
    %27 = vector.broadcast %26 : vector<1x1xf32> to vector<1x8xf32>
    %28 = arith.addf %25, %27 : vector<1x8xf32>
    %c0_18 = arith.constant 0 : index
    %c0_19 = arith.constant 0 : index
    %29 = vector.load %arg8[%c0_18, %c0_19] : memref<1x8xf32, #tpu.memory_space<vmem>>, vector<1x8xf32>
    tpu.vector_store %arg8[%c0_18, %c0_19], %28 {strides = array<i32>} : memref<1x8xf32, #tpu.memory_space<vmem>>, vector<1x8xf32>,
    return
  }
  func.func @transform_0(%arg0: i32) -> (i32, i32) {
    %c0_i32 = arith.constant 0 : i32
    %c0_i32_0 = arith.constant 0 : i32
    return %arg0, %c0_i32 : i32, i32
  }
  func.func @transform_1(%arg0: i32) -> (i32, i32) {
    %c0_i32 = arith.constant 0 : i32
    %c0_i32_0 = arith.constant 0 : i32
    %c0_i32_1 = arith.constant 0 : i32
    return %c0_i32, %c0_i32_0 : i32, i32
  }
  func.func @transform_2(%arg0: i32) -> (i32, i32) {
    %c0_i32 = arith.constant 0 : i32
    %c0_i32_0 = arith.constant 0 : i32
    %c0_i32_1 = arith.constant 0 : i32
    return %c0_i32, %c0_i32_0 : i32, i32
  }
  func.func @transform_3(%arg0: i32) -> (i32, i32) {
    %c0_i32 = arith.constant 0 : i32
    %c0_i32_0 = arith.constant 0 : i32
    %c0_i32_1 = arith.constant 0 : i32
    return %c0_i32, %c0_i32_0 : i32, i32
  }
  func.func @transform_4(%arg0: i32) -> (i32, i32) {
    %c0_i32 = arith.constant 0 : i32
    %c0_i32_0 = arith.constant 0 : i32
    %c0_i32_1 = arith.constant 0 : i32
    return %c0_i32, %c0_i32_0 : i32, i32
  }
  func.func @transform_5(%arg0: i32) -> (i32, i32) {
    %c0_i32 = arith.constant 0 : i32
    %c0_i32_0 = arith.constant 0 : i32
    %c0_i32_1 = arith.constant 0 : i32
    return %c0_i32, %c0_i32_0 : i32, i32
  }
  func.func @transform_6(%arg0: i32) -> (i32, i32) {
    %c0_i32 = arith.constant 0 : i32
    %c0_i32_0 = arith.constant 0 : i32
    %c0_i32_1 = arith.constant 0 : i32
    return %c0_i32, %c0_i32_0 : i32, i32
  }
  func.func @transform_7(%arg0: i32) -> (i32, i32) {
    %c0_i32 = arith.constant 0 : i32
    %c0_i32_0 = arith.constant 0 : i32
    return %c0_i32, %arg0 : i32, i32
  }
}

</mosaic_0001>

<bundles_post_ra>
// kernel: tpu_custom_call.1
= control target key start
LH: loop header
LB: loop body
LE: loop exit
PB: predicated region body
PF: predicated region fallthrough
CT: control target
= control target key end

     0   :  { %s277_s0 = inlined_call_operand.vmem [shape: f32[8,32], index: 0, kind: input, shape index: {}]   ;;  %s278_s1 = inlined_call_operand.vmem [shape: f32[32,10], index: 1, kind: input, shape index: {}]   ;;  %s279_s2 = inlined_call_operand.vmem [shape: f32[1,10], index: 2, kind: input, shape index: {}]   ;;  %s280_s3 = inlined_call_operand.vmem [shape: f32[10,10], index: 3, kind: input, shape index: {}]   ;;  %s281_s4 = inlined_call_operand.vmem [shape: f32[1,10], index: 4, kind: input, shape index: {}]   ;;  %s282_s5 = inlined_call_operand.vmem [shape: f32[1,10], index: 5, kind: input, shape index: {}]   ;;  %s283_s6 = inlined_call_operand.<no memory space> [shape: f32[1,1], index: 6, kind: input, shape index: {}]   ;;  %s284_s7 = inlined_call_operand.hbm [shape: f32[1,8], index: 7, kind: output, shape index: {}]  }
   0x1   :  { %v12_v0 = vstv %s283_s6 }
   0x2   :  { %13 = vst [vmem:[#allocation2] sm:$0x1] %v12_v0 }
   0x3   :  { %v33_v1 = vld [vmem:[%s278_s1 + $0x18] sm:$0xff]  ;;  %v32_v2 = vld [vmem:[%s278_s1 + $0x10] sm:$0xff]  ;;  %v31_v3 = vld [vmem:[%s278_s1 + $0x8] sm:$0xff] }
   0x4   :  { %54 = vmatpush.msra.mxu0 %v33_v1 }
   0x6   :  { %55 = vmatpush.msra.mxu0 %v32_v2 }
   0x7   :  { %14 = vsyncpa [#allocation4], 0  ;;  %v30_v4 = vld [vmem:[%s278_s1] sm:$0xff]  ;;  %vm38_vm0 = vcmask 261120   ;;  %v66_v6 = vld [vmem:[%s280_s3 + $0x8] sm:$0x3]  ;;  %v135_v35 = vlaneseq }
   0x8   :  { %56 = vmatpush.msra.mxu0 %v31_v3  ;;  %v29_v5 = vld [vmem:[%s277_s0] sm:$0xff]  ;;  %vm75_vm1 = vcmask 1041408   ;;  %v197_v9 = vmov 0   ;;  %vm71_vm3 = vcmask 80896   ;;  %vm139_vm8 = vcmask 57344  }
   0x9   :  { %158 = vmatpush.msk.msra.mxu1 %vm75_vm1, %v66_v6  ;;  %v65_v7 = vld [vmem:[%s280_s3] sm:$0xff]  ;;  %163 = vset.pattern.permute.xlu0 %v197_v9  ;;  %v136_v37 = vand.u32 127, %v135_v35 }
   0xa   :  { %57 = vmatpush.msra.mxu0 %v30_v4  ;;  %v126_v8 = vld [vmem:[#allocation2] sm:$0x1] }
   0xb   :  { %157 = vmatmul.msk.f32.vlgmr.msra.gmra.mxu0 %vm38_vm0, %v29_v5  ;;  %94 = vmatpush.msra.mxu1 %v65_v7  ;;  %v164_v10 = vld [vmem:[%s279_s2] ss:$0 sm:$0xff] }
   0xc   :  { %129 = vperm.xlu0 %163, %v126_v8   ;;  %v165_v15 = vld [vmem:[%s281_s4] ss:$0 sm:$0xff]  ;;  %s198_s4 = smov [#allocation3]  }
   0xd   :  { %v166_v28 = vld [vmem:[%s282_s5] ss:$0 sm:$0xff]  ;;  %s146_s18 = sshll.u32 %s198_s4, 4  ;;  %s148_s5 = sshll.u32 %s284_s7, 4  ;;  %s147_s18 = int_to_ptr.vmem [resolvable:$true] %s146_s18  ;;  %s149_s5 = int_to_ptr.hbm [resolvable:$true] %s148_s5 }
  0x7e   :  { %v130_v34 = vpop.permute.xlu0 %129 }
  0x7f   :  { %v132_v36 = vperm.slane %v130_v34, 0 }
  0x88   :  { %v59_v11 = vpop.f32.mrf.mxu0 }
  0x89   :  { %v60_v12 = vadd.f32 %v164_v10, %v59_v11 }
  0x8b   :  { %v63_v13 = vmul.f32 0.01, %v60_v12  ;;  %vm62_vm2 = vcmp.ge.f32.partialorder %v60_v12, 0.0 }
  0x8d   :  { %v64_v14 = vsel %vm62_vm2, %v60_v12, %v63_v13 }
  0x8e   :  { %159 = vmatmul.msk.f32.vlgmr.msra.gmra.mxu1 %vm71_vm3, %v64_v14 }
 0x10b   :  { %v96_v16 = vpop.f32.mrf.mxu1 }
 0x10c   :  { %v97_v17 = vadd.f32 %v165_v15, %v96_v16 }
 0x10e   :  { %v160_v18 = vmul.f32 -1.442695, %v97_v17 }
 0x110   :  { %167 = vpow2.f32 %v160_v18 }
 0x116   :  { %v168_v19 = vpop.eup %167 }
 0x117   :  { %v102_v20 = vadd.f32 1.0, %v168_v19 }
 0x119   :  { %169 = vrcp.f32 %v102_v20  ;;  %v114_v24 = vand.u32 2147483648, %v102_v20  ;;  %v112_v26 = vand.u32 2147483647, %v102_v20  ;;  %vm108_vm5 = vweird.f32 %v102_v20 }
 0x11b   :  { %v115_v29 = vor.u32 1.1754944e-38, %v114_v24  ;;  %vm113_vm7 = vcmp.eq.f32.partialorder %v112_v26, 8.507059e+37 }
 0x11f   :  { %v170_v21 = vpop.eup %169 }
 0x120   :  { %v104_v22 = vmul.f32 %v170_v21, %v102_v20  ;;  %vm109_vm4 = vweird.f32 %v170_v21 }
 0x121   :  { %vm110_vm6 = vmor %vm108_vm5, %vm109_vm4 }
 0x122   :  { %v105_v23 = vsub.f32 1.0, %v104_v22 }
 0x124   :  { %v106_v25 = vmul.f32 %v170_v21, %v105_v23 }
 0x126   :  { %v107_v27 = vadd.f32 %v170_v21, %v106_v25 }
 0x128   :  { %v111_v30 = vsel %vm110_vm6, %v170_v21, %v107_v27 }
 0x129   :  { %v116_v31 = vsel %vm113_vm7, %v115_v29, %v111_v30 }
 0x12a   :  { %v122_v32 = vmul.f32 %v166_v28, %v116_v31 }
 0x12c   :  { %v123_v33 = vsel %vm71_vm3, %v122_v32, 0.0 }
 0x12d   :  { %124 = vadd.xlane.f32.xlu0 %v123_v33 }
 0x1a0   :  { %v125_v38 = vpop.xlane.xlu0 %124 }
 0x1a1   :  { %v133_v39 = vadd.f32 %v132_v36, %v125_v38 }
 0x1a3   :  { %v137_v40 = vperm.slane %v133_v39, %v136_v37 }
 0x1a5   :  { %140 = vst.msk [vmem:[#allocation3] sm:$0x1] %vm139_vm8, %v137_v40 }
 0x1a6   :  { %151 = dma.vmem_to_hbm [thread:$0]  %s147_s18, 16, %s149_s5, [#allocation4]  }
 0x1a7   :  { %195 = dma.done.wait [#allocation4], 16  }
 0x1a8   :  { %196 = vsyncadd [#allocation4], 4294967280 }
 0x1a9   :  { %156 = vsyncpa [#allocation4], 1 }

</bundles_post_ra>
